<compile_context>
chip_gen: v5e
topology: v5e:2x2
jax: 0.10.0
libtpu: 0.0.40
codegen_flags: <defaults>
</compile_context>

<pallas_src>
import functools

import jax
import jax.numpy as jnp
from jax import lax
from jax.experimental import pallas as pl
from jax.experimental.pallas import tpu as pltpu

_LANES = 128
_SUBLANES = 8
_STRIP_ROWS = 512              # multiple of 8/16/32 -> valid for f32/bf16/int8
_PAD_LOGIT = -1e30             # identical pad on both tensors -> exactly-zero KL


def _distill_kl_kernel(ys_ref, yt_ref, part_ref, *, inv_t, rows, block_rows,
                       strip_rows, num_strips, ragged):
    c = ys_ref.shape[-1]
    block_start = pl.program_id(0) * block_rows

    def strip_body(s, acc):
        r0 = pl.multiple_of(s * strip_rows, strip_rows)
        xs = ys_ref[pl.ds(r0, strip_rows), :].astype(jnp.float32) * inv_t
        xt = yt_ref[pl.ds(r0, strip_rows), :].astype(jnp.float32) * inv_t

        if ragged:
            # Rows past the end of the real array hold garbage (no HBM pad
            # copy); force them to a constant so their softmax/KL is exactly 0.
            row_ids = block_start + r0 + lax.broadcasted_iota(
                jnp.int32, (strip_rows, 1), 0)
            valid = row_ids < rows
            xs = jnp.where(valid, xs, _PAD_LOGIT)
            xt = jnp.where(valid, xt, _PAD_LOGIT)

        # Numerically stable softmax statistics along the lane (class) axis.
        m_s = jnp.max(xs, axis=-1, keepdims=True)
        m_t = jnp.max(xt, axis=-1, keepdims=True)
        es = jnp.exp(xs - m_s)
        et = jnp.exp(xt - m_t)
        ss = jnp.sum(es, axis=-1, keepdims=True)
        st = jnp.sum(et, axis=-1, keepdims=True)

        # p_t * (log_softmax(y_t/T) - log_softmax(y_s/T))
        #   = p_t * ((xt - xs) - [(m_t - m_s) + log(st) - log(ss)])
        row_const = (m_t - m_s) + jnp.log(st) - jnp.log(ss)
        p_t = et * pl.reciprocal(st, approx=False)
        contrib = p_t * ((xt - xs) - row_const)          # (strip_rows, c)

        # Fold 8-row groups with plain vreg adds (no extra XLU work).
        fold = contrib.reshape(strip_rows // _SUBLANES, _SUBLANES, c).sum(axis=0)
        return acc + fold

    acc0 = jnp.zeros((_SUBLANES, c), jnp.float32)
    acc = lax.fori_loop(0, num_strips, strip_body, acc0)
    part_ref[...] = acc


def _pick_tiling(rows, c, itemsize):
    """Return (block_rows, strip_rows)."""
    # Native sublane multiple for the input dtype: f32->8, bf16->16, int8->32.
    sub = max(_SUBLANES, 32 // itemsize)
    # ~4 MiB per input tile => 2 inputs x 2 pipeline buffers ~ 16 MiB VMEM,
    # plus strip-sized f32 scratch; fits v7x's 64 MiB with large headroom.
    # TODO(synk): very large class counts (c*itemsize*sub > ~4 MiB) would need
    # a class-dim split (two-pass softmax); not done here.
    target_bytes = 4 * 1024 * 1024
    br = max(sub, target_bytes // (c * itemsize))
    # Keep >= 2 grid blocks whenever rows allow it (v7x: feed both TensorCores).
    br = min(br, max(sub, pl.cdiv(rows, 2)))
    if br >= _STRIP_ROWS:
        br = (br // _STRIP_ROWS) * _STRIP_ROWS
        strip = _STRIP_ROWS
    else:
        br = max(sub, (br // sub) * sub)
        strip = br
    return int(br), int(strip)


def distill_kl(y_s, y_t, T):
    """KL distillation loss matching PyTorch DistillKL.forward (scalar)."""
    assert y_s.shape == y_t.shape
    T = float(T)
    n_batch = y_s.shape[0]

    # softmax is over dim=1; put the class dim last and flatten the rest.
    if y_s.ndim != 2:
        # TODO(synk): tile the native (N, C, spatial) layout and softmax over
        # the sublane (C) axis in-kernel to avoid this transposed HBM copy.
        c = y_s.shape[1]
        y_s = jnp.moveaxis(y_s, 1, -1).reshape(-1, c)
        y_t = jnp.moveaxis(y_t, 1, -1).reshape(-1, c)
    rows, c = y_s.shape

    itemsize = jnp.dtype(y_s.dtype).itemsize
    block_rows, strip_rows = _pick_tiling(rows, c, itemsize)
    num_blocks = pl.cdiv(rows, block_rows)
    num_strips = block_rows // strip_rows
    ragged = (rows % block_rows) != 0

    kernel = functools.partial(
        _distill_kl_kernel, inv_t=1.0 / T, rows=rows, block_rows=block_rows,
        strip_rows=strip_rows, num_strips=num_strips, ragged=ragged)

    partials = pl.pallas_call(
        kernel,
        out_shape=jax.ShapeDtypeStruct((num_blocks * _SUBLANES, c), jnp.float32),
        grid=(num_blocks,),
        in_specs=[
            pl.BlockSpec((block_rows, c), lambda i: (i, 0)),
            pl.BlockSpec((block_rows, c), lambda i: (i, 0)),
        ],
        out_specs=pl.BlockSpec((_SUBLANES, c), lambda i: (i, 0)),
        compiler_params=pltpu.CompilerParams(
            dimension_semantics=("parallel",),        # megacore-splittable
            vmem_limit_bytes=32 * 1024 * 1024,
        ),
    )(y_s, y_t)

    # Tiny final reduce + scale (multiply by precomputed T^2 / batch).
    return jnp.sum(partials) * jnp.float32(T * T / n_batch)


def _distill_kl_ref(y_s, y_t, T):
    p_s = jax.nn.log_softmax(y_s / T, axis=1)
    p_t = jax.nn.softmax(y_t / T, axis=1)
    kl = jnp.where(p_t > 0, p_t * (jnp.log(p_t) - p_s), 0.0)
    return jnp.sum(kl) * (T ** 2) / y_s.shape[0]


if __name__ == "__main__":
    key = jax.random.PRNGKey(0)
    temperature = 4.0

    # (batch, num_classes) logits; cases exercise even blocks, a ragged last
    # block (in-kernel row masking, no pad copy), and a sub-32-bit dtype.
    cases = [
        ((64, 100), jnp.float32),
        ((50, 100), jnp.float32),
        ((48, 100), jnp.bfloat16),
    ]
    for i, (shape, dtype) in enumerate(cases):
        k1, k2 = jax.random.split(jax.random.fold_in(key, i))
        y_s = (jax.random.normal(k1, shape, dtype=jnp.float32) * 2.0).astype(dtype)
        y_t = (jax.random.normal(k2, shape, dtype=jnp.float32) * 2.0).astype(dtype)

        out = jax.block_until_ready(distill_kl(y_s, y_t, temperature))
        ref = _distill_kl_ref(y_s.astype(jnp.float32), y_t.astype(jnp.float32),
                              temperature)
        assert jnp.allclose(out, ref, rtol=1e-3, atol=1e-5), (shape, dtype, out, ref)

    print("KERNEL_OK")
</pallas_src>

<mosaic_0001>
module attributes {stable_mosaic.version = 11 : i64} {
  func.func @_distill_kl_kernel(%arg0: i32, %arg1: memref<32x100xf32, #tpu.memory_space<vmem>>, %arg2: memref<32x100xf32, #tpu.memory_space<vmem>>, %arg3: memref<8x100xf32, #tpu.memory_space<vmem>>) attributes {dimension_semantics = [#tpu.dimension_semantics<parallel>], iteration_bounds = array<i64: 2>, scalar_prefetch = 0 : i64, scratch_operands = 0 : i64, tpu.core_type = #tpu.core_type<tc>, window_params = [{transform_indices = @transform_0, window_bounds = array<i64: 32, 100>}, {transform_indices = @transform_1, window_bounds = array<i64: 32, 100>}, {transform_indices = @transform_2, window_bounds = array<i64: 8, 100>}]} {
    %cst = arith.constant 0.000000e+00 : f32
    %0 = vector.broadcast %cst : f32 to vector<8x100xf32>
    %c0_i32 = arith.constant 0 : i32
    %c32_i32 = arith.constant 32 : i32
    %1 = arith.muli %c0_i32, %c32_i32 : i32
    %2 = tpu.assume_multiple %1, 32 : i32
    %3 = arith.index_cast %2 : i32 to index
    %c0 = arith.constant 0 : index
    %4 = vector.load %arg1[%3, %c0] : memref<32x100xf32, #tpu.memory_space<vmem>>, vector<32x100xf32>
    %cst_0 = arith.constant 2.500000e-01 : f32
    %5 = vector.broadcast %cst_0 : f32 to vector<32x100xf32>
    %6 = arith.mulf %4, %5 : vector<32x100xf32>
    %7 = arith.index_cast %2 : i32 to index
    %c0_1 = arith.constant 0 : index
    %8 = vector.load %arg2[%7, %c0_1] : memref<32x100xf32, #tpu.memory_space<vmem>>, vector<32x100xf32>
    %cst_2 = arith.constant 2.500000e-01 : f32
    %9 = vector.broadcast %cst_2 : f32 to vector<32x100xf32>
    %10 = arith.mulf %8, %9 : vector<32x100xf32>
    %cst_3 = arith.constant dense<0xFF800000> : vector<32xf32>
    %11 = vector.multi_reduction <maximumf>, %6, %cst_3 [1] : vector<32x100xf32> to vector<32xf32>
    %12 = vector.shape_cast %11 : vector<32xf32> to vector<32x1xf32>
    %cst_4 = arith.constant dense<0xFF800000> : vector<32xf32>
    %13 = vector.multi_reduction <maximumf>, %10, %cst_4 [1] : vector<32x100xf32> to vector<32xf32>
    %14 = vector.shape_cast %13 : vector<32xf32> to vector<32x1xf32>
    %15 = vector.broadcast %12 : vector<32x1xf32> to vector<32x100xf32>
    %16 = arith.subf %6, %15 : vector<32x100xf32>
    %17 = math.exp %16 : vector<32x100xf32>
    %18 = vector.broadcast %14 : vector<32x1xf32> to vector<32x100xf32>
    %19 = arith.subf %10, %18 : vector<32x100xf32>
    %20 = math.exp %19 : vector<32x100xf32>
    %cst_5 = arith.constant dense<0.000000e+00> : vector<32xf32>
    %21 = vector.multi_reduction <add>, %17, %cst_5 [1] : vector<32x100xf32> to vector<32xf32>
    %22 = vector.shape_cast %21 : vector<32xf32> to vector<32x1xf32>
    %cst_6 = arith.constant dense<0.000000e+00> : vector<32xf32>
    %23 = vector.multi_reduction <add>, %20, %cst_6 [1] : vector<32x100xf32> to vector<32xf32>
    %24 = vector.shape_cast %23 : vector<32xf32> to vector<32x1xf32>
    %25 = arith.subf %14, %12 : vector<32x1xf32>
    %26 = math.log %24 : vector<32x1xf32>
    %27 = arith.addf %25, %26 : vector<32x1xf32>
    %28 = math.log %22 : vector<32x1xf32>
    %29 = arith.subf %27, %28 : vector<32x1xf32>
    %30 = tpu.reciprocal %24 : vector<32x1xf32> -> vector<32x1xf32>
    %31 = vector.broadcast %30 : vector<32x1xf32> to vector<32x100xf32>
    %32 = arith.mulf %20, %31 : vector<32x100xf32>
    %33 = arith.subf %10, %6 : vector<32x100xf32>
    %34 = vector.broadcast %29 : vector<32x1xf32> to vector<32x100xf32>
    %35 = arith.subf %33, %34 : vector<32x100xf32>
    %36 = arith.mulf %32, %35 : vector<32x100xf32>
    %37 = vector.shape_cast %36 : vector<32x100xf32> to vector<4x8x100xf32>
    %cst_7 = arith.constant dense<0.000000e+00> : vector<8x100xf32>
    %38 = vector.multi_reduction <add>, %37, %cst_7 [0] : vector<4x8x100xf32> to vector<8x100xf32>
    %39 = arith.addf %0, %38 : vector<8x100xf32>
    %c1_i32 = arith.constant 1 : i32
    %c0_8 = arith.constant 0 : index
    %c0_9 = arith.constant 0 : index
    %40 = vector.load %arg3[%c0_8, %c0_9] : memref<8x100xf32, #tpu.memory_space<vmem>>, vector<8x100xf32>
    tpu.vector_store %arg3[%c0_8, %c0_9], %39 {strides = array<i32>} : memref<8x100xf32, #tpu.memory_space<vmem>>, vector<8x100xf32>,
    return
  }
  func.func @transform_0(%arg0: i32) -> (i32, i32) {
    %c0_i32 = arith.constant 0 : i32
    %c0_i32_0 = arith.constant 0 : i32
    return %arg0, %c0_i32 : i32, i32
  }
  func.func @transform_1(%arg0: i32) -> (i32, i32) {
    %c0_i32 = arith.constant 0 : i32
    %c0_i32_0 = arith.constant 0 : i32
    return %arg0, %c0_i32 : i32, i32
  }
  func.func @transform_2(%arg0: i32) -> (i32, i32) {
    %c0_i32 = arith.constant 0 : i32
    %c0_i32_0 = arith.constant 0 : i32
    return %arg0, %c0_i32 : i32, i32
  }
}

</mosaic_0001>

<bundles_post_ra>
// kernel: tpu_custom_call.1
= control target key start
LH: loop header
LB: loop body
LE: loop exit
PB: predicated region body
PF: predicated region fallthrough
CT: control target
= control target key end

     0   :  { %7 = vsyncpa [#allocation3], 0  ;;  %s1158_s0 = inlined_call_operand.hbm [shape: f32[64,100], index: 0, kind: input, shape index: {}]   ;;  %s1159_s1 = inlined_call_operand.hbm [shape: f32[64,100], index: 1, kind: input, shape index: {}]   ;;  %s1160_s2 = inlined_call_operand.hbm [shape: f32[16,100], index: 2, kind: output, shape index: {}]  }
   0x1   :  { %9 = vsyncpa [#allocation3 + $0x1], 0 }
   0x2   :  { %10 = vsyncpa [#allocation6], 0 }
   0x3   :  { %12 = vsyncpa [#allocation6 + $0x1], 0 }
   0x4   :  { %13 = vsyncpa [#allocation4], 0 }
   0x5   :  { %15 = vsyncpa [#allocation4 + $0x1], 0  ;;  %s776_s9 = smov 0   ;;  %s778_s10 = smov 0  }
   0x6   :  { %s780_s11 = smov 0   ;;  %s782_s12 = smov 0  }
   0x7 LB: > { %s797_s13 = sadd.s32 4294967295, %s757_s12   ;;  %s515_s14 = sadd.s32 4294967294, %s757_s12   ;;  %s757_s12 = sphi %s782_s12, %s1183_s12   ;;  %s753_s11 = sphi %s780_s11, %s1182_s11   ;;  %s749_s10 = sphi %s778_s10, %s1181_s10   ;;  %s745_s9 = sphi %s776_s9, %s1180_s9  }
   0x8   : > { %s801_s15 = sadd.s32 1, %s757_s12   ;;  %s28_s16 = sadd.s32 1, %s753_s11 }
   0x9   : > { %s25_s17 = ssub.s32 %s757_s12, %s801_s15  ;;  %p35_p0 = scmp.ne.s32.totalorder %s753_s11, %s749_s10 }
   0xa   : > { %p26_p1 = scmp.eq.s32.totalorder %s25_s17, 0  ;;  %p36_p2 = scmp.eq.s32.totalorder %s757_s12, 0 }
   0xb   : > { %p41_p3 = scmp.ne.s32.totalorder %s749_s10, %s745_s9  ;;  %p42_p4 = scmp.eq.s32.totalorder %s797_s13, 0 }
   0xc   : > { %s813_s18 = scalar_select %p26_p1, %s753_s11, %s28_s16  }
   0xd   : > { %p815_p5 = por %p36_p2, %p35_p0  ;;  %p819_p6 = por %p42_p4, %p41_p3 }
   0xe   : > { %p91_p7 = scmp.eq.s32.totalorder %s797_s13, 1  ;;  %p97_p8 = scmp.eq.s32.totalorder %s515_s14, 1 }
   0xf   : > { %p551_p10 = scmp.lt.s32.totalorder %s757_s12, 2  ;;  %s835_s23 = sand.u32 1, %s753_s11  }
  0x10   : > { %p826_p11 = por %p91_p7, %p35_p0  ;;  %p830_p12 = por %p97_p8, %p41_p3 }
  0x11   : > { %s532_s24 = sshll.u32 %s757_s12, 5  ;;  %s518_s25 = sshll.u32 %s835_s23, 5 }
  0x12   : > { %s126_s28 = scalar_lea.hbm %s1158_s0, %s532_s24  ;;  %s121_s30 = scalar_lea.vmem [#allocation2], %s518_s25 }
  0x13   : > { %s127_s29 = sshll.u32 %s126_s28, 4  ;;  %s129_s3 = sshll.u32 %s121_s30, 4  ;;  %s128_s29 = int_to_ptr.hbm [resolvable:$true] %s127_s29  ;;  %s130_s3 = int_to_ptr.vmem [resolvable:$true] %s129_s3 }
  0x14   : > { %p848_p13 = pnand %p551_p10, %p815_p5  ;;  %p524_p0 = scmp.ge.s32.totalorder %s757_s12, 1 }
  0x15   : > { %p159_p1 = scmp.lt.s32.totalorder %s757_s12, 3  ;;  %s118_s5 = scalar_lea.sflag [#allocation3], %s835_s23 }
  0x16   : > { %s627_s6 = sshra.s32 %s128_s29, 4  ;;  %p631_p3 = pneg %p848_p13  ;;  %s628_s6 = int_to_ptr.hbm [resolvable:$true] %s627_s6 }
  0x17   : > { %s629_s7 = scalar_lea.hbm %s628_s6, 32  ;;  %s634_s16 = scalar_lea.hbm %s1158_s0, 64 }
  0x18   : > { %p630_p2 = scmp.ne.s32.totalorder %s628_s6, %s629_s7  ;;  %p635_p5 = scmp.lt.s32.totalorder %s628_s6, %s1158_s0 }
  0x19   : > { %p636_p8 = scmp.lt.s32.totalorder %s634_s16, %s629_s7 }
  0x1a   : > { %p632_p4 = pnand %p631_p3, %p630_p2 }
  0x1b   : > { %p637_p10 = por %p636_p8, %p635_p5 }
  0x1c   : > { %p633_p7 = pneg %p632_p4 }
  0x1e   : > { %p638_p9 = pnand %p637_p10, %p633_p7 }
  0x20   : > { %641 = shalt.err (!%p638_p9)
}
  0x21   : > { %s759_s26 = smov 128   ;;  %s760_s27 = smov 8  }
  0x22   : > { %543 = dma.hbm_to_vmem [thread:$0]  (!%p848_p13), %s128_s29, 512, %s130_s3, %s118_s5, %s759_s26, %s759_s26, %s760_s27  }
  0x23   : > { %p872_p2 = pnand %p524_p0, %p159_p1  ;;  %s148_s7 = scalar_lea.hbm %s1159_s1, %s532_s24 }
  0x24   : > { %s149_s8 = sshll.u32 %s148_s7, 4  ;;  %s143_s14 = scalar_lea.vmem [#allocation5], %s518_s25  ;;  %s150_s8 = int_to_ptr.hbm [resolvable:$true] %s149_s8 }
  0x25   : > { %s151_s16 = sshll.u32 %s143_s14, 4  ;;  %s140_s17 = scalar_lea.sflag [#allocation6], %s835_s23  ;;  %s152_s16 = int_to_ptr.vmem [resolvable:$true] %s151_s16 }
  0x26   : > { %s657_s19 = sshra.s32 %s150_s8, 4  ;;  %s664_s30 = scalar_lea.hbm %s1159_s1, 64  ;;  %s658_s19 = int_to_ptr.hbm [resolvable:$true] %s657_s19 }
  0x27   : > { %s659_s29 = scalar_lea.hbm %s658_s19, 32  ;;  %p665_p4 = scmp.lt.s32.totalorder %s658_s19, %s1159_s1 }
  0x28   : > { %p660_p9 = scmp.ne.s32.totalorder %s658_s19, %s659_s29  ;;  %p666_p7 = scmp.lt.s32.totalorder %s664_s30, %s659_s29 }
  0x2a   : > { %p662_p0 = pnand %p660_p9, %p631_p3  ;;  %p667_p5 = por %p666_p7, %p665_p4 }
  0x2c   : > { %p663_p1 = pneg %p662_p0 }
  0x2e   : > { %p668_p8 = pnand %p667_p5, %p663_p1 }
  0x30   : > { %671 = shalt.err (!%p668_p8)
}
  0x31   : > { %546 = dma.hbm_to_vmem [thread:$0]  (!%p848_p13), %s150_s8, 512, %s152_s16, %s140_s17, %s759_s26, %s759_s26, %s760_s27  }
  0x32   : > { %163 = sbr.rel (%p872_p2) target bundleno = 352 (0x160), region = 28  ;;  %s898_s23 = sand.u32 (!%p872_p2), 1, %s749_s10  }
  0x33   : > { %s525_s25 = sshll.u32 (!%p872_p2), %s898_s23, 5  ;;  %s166_s7 = scalar_lea.sflag (!%p872_p2), [#allocation3], %s898_s23 }
  0x34   : > { %s169_s14 = scalar_lea.vmem (!%p872_p2), [#allocation2], %s525_s25 }
  0x37   : > { %732 = dma.done.wait (%p819_p6), %s166_s7, 512  }
  0x38   : > { %734 = vsyncadd (%p819_p6), %s166_s7, 4294966784  ;;  %s176_s4 = scalar_lea.sflag [#allocation6], %s898_s23  ;;  %s179_s26 = scalar_lea.vmem [#allocation5], %s525_s25 }
  0x39   : > { %736 = dma.done.wait (%p819_p6), %s176_s4, 512  }
  0x3a   : > { %738 = vsyncadd (%p819_p6), %s176_s4, 4294966784  ;;  %v218_v0 = vld [vmem:[%s179_s26 + $0x10] sm:$0xff]  ;;  %vm224_vm0 = vcmask 818176   ;;  %v216_v1 = vld [vmem:[%s179_s26] sm:$0xff]  ;;  %s527_s20 = sshll.u32 %s898_s23, 3  ;;  %s529_s27 = sshll.u32 %s797_s13, 3 }
  0x3b   : > { %v208_v2 = vld [vmem:[%s169_s14] sm:$0xff]  ;;  %v911_v3 = vmul.f32 0.25, %v218_v0  ;;  %v913_v4 = vmul.f32 0.25, %v216_v1  ;;  %v219_v6 = vld [vmem:[%s179_s26 + $0x18] sm:$0xff]  ;;  %v217_v7 = vld [vmem:[%s179_s26 + $0x8] sm:$0xff]  ;;  %s417_s16 = scalar_lea.hbm %s1160_s2, %s529_s27  ;;  %s205_s17 = scalar_lea.vmem [#allocation7], %s527_s20 }
  0x3c   : > { %v915_v5 = vmul.f32 0.25, %v208_v2  ;;  %v209_v11 = vld [vmem:[%s169_s14 + $0x8] sm:$0xff]  ;;  %v923_v12 = vmul.f32 0.25, %v219_v6  ;;  %v925_v13 = vmul.f32 0.25, %v217_v7  ;;  %v211_v18 = vld [vmem:[%s169_s14 + $0x18] sm:$0xff]  ;;  %v210_v19 = vld [vmem:[%s169_s14 + $0x10] sm:$0xff] }
  0x3d   : > { %v243_v8 = vsel %vm224_vm0, %v911_v3, -inf  ;;  %v237_v9 = vsel %vm224_vm0, %v913_v4, -inf  ;;  %v927_v14 = vmul.f32 0.25, %v209_v11  ;;  %v935_v20 = vmul.f32 0.25, %v211_v18  ;;  %s419_s19 = sshll.u32 %s205_s17, 4  ;;  %s421_s29 = sshll.u32 %s417_s16, 4  ;;  %s420_s19 = int_to_ptr.vmem [resolvable:$true] %s419_s19  ;;  %s422_s29 = int_to_ptr.hbm [resolvable:$true] %s421_s29 }
  0x3e   : > { %v225_v10 = vsel %vm224_vm0, %v915_v5, -inf  ;;  %244 = vmax.xlane.f32.xlu1 %v243_v8  ;;  %238 = vmax.xlane.f32.xlu0 %v237_v9  ;;  %v246_v15 = vsel %vm224_vm0, %v923_v12, -inf  ;;  %v240_v16 = vsel %vm224_vm0, %v925_v13, -inf  ;;  %v937_v21 = vmul.f32 0.25, %v210_v19  ;;  %s407_s13 = scalar_lea.sflag [#allocation4], %s898_s23  ;;  %s701_s3 = sshra.s32 %s422_s29, 4  ;;  %s702_s3 = int_to_ptr.hbm [resolvable:$true] %s701_s3 }
  0x3f   : > { %226 = vmax.xlane.f32.xlu2 %v225_v10  ;;  %v228_v17 = vsel %vm224_vm0, %v927_v14, -inf  ;;  %v234_v22 = vsel %vm224_vm0, %v935_v20, -inf  ;;  %s703_s5 = scalar_lea.hbm %s702_s3, 8  ;;  %s707_s6 = scalar_lea.hbm %s1160_s2, 16 }
  0x40   : > { %v231_v23 = vsel %vm224_vm0, %v937_v21, -inf  ;;  %p704_p6 = scmp.ne.s32.totalorder %s702_s3, %s703_s5  ;;  %p708_p10 = scmp.lt.s32.totalorder %s702_s3, %s1160_s2 }
  0x41   : > { %p709_p2 = scmp.lt.s32.totalorder %s707_s6, %s703_s5 }
  0x42   : > { %p705_p13 = pnand %p704_p6, %p826_p11 }
  0x43   : > { %p710_p9 = por %p709_p2, %p708_p10 }
  0x44   : > { %p706_p3 = pneg %p705_p13 }
  0x46   : > { %247 = vmax.xlane.f32.xlu1 %v246_v15  ;;  %241 = vmax.xlane.f32.xlu0 %v240_v16  ;;  %p711_p0 = pnand %p710_p9, %p706_p3 }
  0x47   : > { %229 = vmax.xlane.f32.xlu2 %v228_v17 }
  0x4e   : > { %235 = vmax.xlane.f32.xlu1 %v234_v22  ;;  %232 = vmax.xlane.f32.xlu0 %v231_v23 }
  0xb1   : > { %v943_v24 = vpop.xlane.xlu1 %244  ;;  %v945_v25 = vpop.xlane.xlu0 %238 }
  0xb2   : > { %v263_v26 = vsub.f32 %v911_v3, %v943_v24  ;;  %v261_v27 = vsub.f32 %v913_v4, %v945_v25  ;;  %v951_v28 = vpop.xlane.xlu2 %226 }
  0xb3   : > { %v297_v29 = vsub.f32 %v945_v25, %v951_v28  ;;  %v249_v42 = vsub.f32 %v915_v5, %v951_v28 }
  0xb4   : > { %v269_v30 = vmul.f32 1.442695, %v263_v26  ;;  %v265_v31 = vmul.f32 1.442695, %v261_v27 }
  0xb5   : > { %v253_v46 = vmul.f32 1.442695, %v249_v42 }
  0xb6   : > { %587 = vpow2.f32 %v269_v30 }
  0xb7   : > { %589 = vpow2.f32 %v265_v31  ;;  %v386_v31 = vsub.f32 %v925_v13, %v927_v14 }
  0xb9   : > { %v955_v32 = vpop.xlane.xlu1 %247  ;;  %v957_v33 = vpop.xlane.xlu0 %241 }
  0xba   : > { %v264_v34 = vsub.f32 %v923_v12, %v955_v32  ;;  %v262_v35 = vsub.f32 %v925_v13, %v957_v33  ;;  %v963_v36 = vpop.xlane.xlu2 %229 }
  0xbb   : > { %v250_v37 = vsub.f32 %v927_v14, %v963_v36  ;;  %v298_v22 = vsub.f32 %v957_v33, %v963_v36  ;;  %v385_v33 = vsub.f32 %v913_v4, %v915_v5 }
  0xbc   : > { %v967_v38 = vpop.eup %587  ;;  %v271_v39 = vmul.f32 1.442695, %v264_v34  ;;  %v267_v40 = vmul.f32 1.442695, %v262_v35 }
  0xbd   : > { %v969_v41 = vpop.eup %589  ;;  %v255_v43 = vmul.f32 1.442695, %v250_v37  ;;  %v291_v44 = vsel %vm224_vm0, %v967_v38, 0.0 }
  0xbe   : > { %591 = vpow2.f32 %v271_v39  ;;  %292 = vadd.xlane.f32.xlu1 %v291_v44  ;;  %v285_v45 = vsel %vm224_vm0, %v969_v41, 0.0 }
  0xbf   : > { %593 = vpow2.f32 %v267_v40  ;;  %286 = vadd.xlane.f32.xlu2 %v285_v45  ;;  %v387_v40 = vsub.f32 %v911_v3, %v937_v21 }
  0xc0   : > { %595 = vpow2.f32 %v255_v43 }
  0xc1   : > { %v977_v47 = vpop.xlane.xlu0 %232  ;;  %v979_v48 = vpop.xlane.xlu1 %235  ;;  %597 = vpow2.f32 %v253_v46 }
  0xc2   : > { %v251_v49 = vsub.f32 %v937_v21, %v977_v47  ;;  %v252_v50 = vsub.f32 %v935_v20, %v979_v48  ;;  %v299_v27 = vsub.f32 %v943_v24, %v977_v47  ;;  %v300_v4 = vsub.f32 %v955_v32, %v979_v48 }
  0xc4   : > { %v985_v51 = vpop.eup %591  ;;  %v257_v52 = vmul.f32 1.442695, %v251_v49  ;;  %v259_v57 = vmul.f32 1.442695, %v252_v50 }
  0xc5   : > { %v987_v53 = vpop.eup %593  ;;  %v294_v54 = vsel %vm224_vm0, %v985_v51, 0.0 }
  0xc6   : > { %v596_v55 = vpop.eup %595  ;;  %v288_v56 = vsel %vm224_vm0, %v987_v53, 0.0  ;;  %599 = vpow2.f32 %v257_v52 }
  0xc7   : > { %289 = vadd.xlane.f32.xlu0 %v288_v56  ;;  %295 = vadd.xlane.f32.xlu2 %v294_v54  ;;  %v276_v58 = vsel %vm224_vm0, %v596_v55, 0.0  ;;  %v598_v59 = vpop.eup %597  ;;  %601 = vpow2.f32 %v259_v57 }
  0xc8   : > { %277 = vadd.xlane.f32.xlu1 %v276_v58  ;;  %v273_v62 = vsel %vm224_vm0, %v598_v59, 0.0 }
  0xcc   : > { %v600_v60 = vpop.eup %599 }
  0xcd   : > { %v279_v61 = vsel %vm224_vm0, %v600_v60, 0.0  ;;  %v602_v63 = vpop.eup %601 }
  0xce   : > { %v282_v0 = vsel %vm224_vm0, %v602_v63, 0.0 }
  0xcf   : > { %280 = vadd.xlane.f32.xlu2 %v279_v61  ;;  %274 = vadd.xlane.f32.xlu0 %v273_v62 }
  0xd7   : > { %283 = vadd.xlane.f32.xlu0 %v282_v0 }
 0x131   : > { %v997_v1 = vpop.xlane.xlu1 %292 }
 0x132   : > { %603 = vrcp.f32 %v997_v1  ;;  %v287_v2 = vpop.xlane.xlu2 %286  ;;  %v364_v18 = vand.u32 2147483648, %v997_v1  ;;  %v362_v23 = vand.u32 2147483647, %v997_v1  ;;  %vm358_vm1 = vweird.f32 %v997_v1 }
 0x133   : > { %605 = vrcp.f32 %v287_v2  ;;  %v334_v19 = vand.u32 2147483647, %v287_v2  ;;  %vm330_vm2 = vweird.f32 %v287_v2  ;;  %v336_v24 = vand.u32 2147483648, %v287_v2 }
 0x134   : > { %607 = vlog2.f32 %v287_v2  ;;  %v365_v37 = vor.u32 1.1754944e-38, %v364_v18  ;;  %vm1037_vm5 = vcmp.eq.f32.partialorder %v362_v23, 8.507059e+37 }
 0x135   : > { %609 = vlog2.f32 %v997_v1  ;;  %vm1028_vm3 = vcmp.eq.f32.partialorder %v334_v19, 8.507059e+37  ;;  %v337_v63 = vor.u32 1.1754944e-38, %v336_v24 }
 0x138   : > { %v1000_v6 = vpop.eup %603 }
 0x139   : > { %v1002_v7 = vpop.eup %605  ;;  %v354_v8 = vmul.f32 %v1000_v6, %v997_v1  ;;  %vm359_vm4 = vweird.f32 %v1000_v6 }
 0x13a   : > { %v326_v9 = vmul.f32 %v1002_v7, %v287_v2  ;;  %v1007_v10 = vpop.xlane.xlu0 %289  ;;  %v1009_v11 = vpop.xlane.xlu2 %295  ;;  %vm331_vm6 = vweird.f32 %v1002_v7  ;;  %vm1061_vm9 = vmor %vm358_vm1, %vm359_vm4 }
 0x13b   : > { %611 = vrcp.f32 %v1007_v10  ;;  %v355_v15 = vsub.f32 1.0, %v354_v8  ;;  %v278_v17 = vpop.xlane.xlu1 %277  ;;  %v608_v26 = vpop.eup %607  ;;  %v348_v45 = vand.u32 2147483647, %v1007_v10  ;;  %v350_v50 = vand.u32 2147483648, %v1007_v10  ;;  %vm1053_vm7 = vmor %vm330_vm2, %vm331_vm6 }
 0x13c   : > { %v327_v16 = vsub.f32 1.0, %v326_v9  ;;  %613 = vrcp.f32 %v1009_v11  ;;  %v610_v34 = vpop.eup %609  ;;  %v302_v57 = vmul.f32 0.6931472, %v608_v26  ;;  %vm344_vm10 = vweird.f32 %v1007_v10 }
 0x13d   : > { %615 = vlog2.f32 %v1007_v10  ;;  %v356_v35 = vmul.f32 %v1000_v6, %v355_v15  ;;  %v306_v61 = vmul.f32 0.6931472, %v610_v34  ;;  %vm372_vm11 = vweird.f32 %v1009_v11 }
 0x13e   : > { %v328_v30 = vmul.f32 %v1002_v7, %v327_v16  ;;  %617 = vlog2.f32 %v278_v17  ;;  %vm1070_vm12 = vcmp.eq.f32.partialorder %v348_v45, 8.507059e+37  ;;  %v378_v39 = vand.u32 2147483648, %v1009_v11 }
 0x13f   : > { %v357_v55 = vadd.f32 %v1000_v6, %v356_v35 }
 0x140   : > { %v329_v49 = vadd.f32 %v1002_v7, %v328_v30 }
 0x141   : > { %v612_v36 = vpop.eup %611  ;;  %v361_v18 = vsel %vm1061_vm9, %v1000_v6, %v357_v55 }
 0x142   : > { %v1034_v42 = vpop.eup %613  ;;  %v340_v44 = vmul.f32 %v612_v36, %v1007_v10  ;;  %v275_v46 = vpop.xlane.xlu0 %274  ;;  %vm345_vm8 = vweird.f32 %v612_v36  ;;  %v333_v15 = vsel %vm1053_vm7, %v1002_v7, %v329_v49  ;;  %v351_v10 = vor.u32 1.1754944e-38, %v350_v50 }
 0x143   : > { %v281_v47 = vpop.xlane.xlu2 %280  ;;  %v368_v52 = vmul.f32 %v1034_v42, %v1009_v11  ;;  %619 = vlog2.f32 %v275_v46  ;;  %v616_v54 = vpop.eup %615  ;;  %vm346_vm13 = vmor %vm344_vm10, %vm345_vm8  ;;  %v311_v7 = vadd.f32 %v306_v61, %v299_v27  ;;  %vm373_vm14 = vweird.f32 %v1034_v42 }
 0x144   : > { %v341_v56 = vsub.f32 1.0, %v340_v44  ;;  %621 = vlog2.f32 %v281_v47  ;;  %v618_v58 = vpop.eup %617  ;;  %v304_v60 = vmul.f32 0.6931472, %v616_v54  ;;  %v338_v35 = vsel %vm1028_vm3, %v337_v63, %v333_v15  ;;  %vm1103_vm15 = vmor %vm372_vm11, %vm373_vm14 }
 0x145   : > { %v369_v59 = vsub.f32 1.0, %v368_v52  ;;  %623 = vlog2.f32 %v1009_v11  ;;  %v316_v8 = vmul.f32 0.6931472, %v618_v58  ;;  %v366_v45 = vsel %vm1037_vm5, %v365_v37, %v361_v18 }
 0x146   : > { %v342_v0 = vmul.f32 %v612_v36, %v341_v56  ;;  %v310_v2 = vadd.f32 %v304_v60, %v298_v22  ;;  %v309_v22 = vadd.f32 %v302_v57, %v297_v29  ;;  %v381_v43 = vmul.f32 %v969_v41, %v338_v35 }
 0x147   : > { %v370_v1 = vmul.f32 %v1034_v42, %v369_v59  ;;  %v383_v14 = vmul.f32 %v967_v38, %v366_v45  ;;  %v388_v52 = vsub.f32 %v923_v12, %v935_v20 }
 0x148   : > { %v343_v16 = vadd.f32 %v612_v36, %v342_v0  ;;  %v322_v23 = vsub.f32 %v310_v2, %v316_v8 }
 0x149   : > { %v620_v19 = vpop.eup %619  ;;  %v371_v25 = vadd.f32 %v1034_v42, %v370_v1 }
 0x14a   : > { %v622_v26 = vpop.eup %621  ;;  %v347_v30 = vsel %vm346_vm13, %v612_v36, %v343_v16  ;;  %v314_v34 = vmul.f32 0.6931472, %v620_v19  ;;  %v284_v24 = vpop.xlane.xlu0 %283  ;;  %v390_v29 = vsub.f32 %v386_v31, %v322_v23  ;;  %v376_v36 = vand.u32 2147483647, %v1009_v11 }
 0x14b   : > { %v624_v44 = vpop.eup %623  ;;  %v352_v6 = vsel %vm1070_vm12, %v351_v10, %v347_v30  ;;  %v318_v46 = vmul.f32 0.6931472, %v622_v26  ;;  %625 = vlog2.f32 %v284_v24  ;;  %v379_v31 = vor.u32 1.1754944e-38, %v378_v39 }
 0x14c   : > { %v382_v28 = vmul.f32 %v987_v53, %v352_v6  ;;  %v321_v27 = vsub.f32 %v309_v22, %v314_v34  ;;  %v308_v50 = vmul.f32 0.6931472, %v624_v44  ;;  %v375_v53 = vsel %vm1103_vm15, %v1034_v42, %v371_v25 }
 0x14d   : > { %v323_v47 = vsub.f32 %v311_v7, %v318_v46  ;;  %vm377_vm1 = vcmp.eq.f32.partialorder %v376_v36, 8.507059e+37 }
 0x14e   : > { %v394_v49 = vmul.f32 %v390_v29, %v382_v28  ;;  %v389_v37 = vsub.f32 %v385_v33, %v321_v27  ;;  %v312_v21 = vadd.f32 %v308_v50, %v300_v4  ;;  %v380_v48 = vsel %vm377_vm1, %v379_v31, %v375_v53 }
 0x14f   : > { %v391_v41 = vsub.f32 %v387_v40, %v323_v47  ;;  %v384_v12 = vmul.f32 %v985_v51, %v380_v48 }
 0x150   : > { %v393_v5 = vmul.f32 %v389_v37, %v381_v43  ;;  %v398_v38 = vsel %vm224_vm0, %v394_v49, 0.0 }
 0x151   : > { %v626_v11 = vpop.eup %625  ;;  %v395_v33 = vmul.f32 %v391_v41, %v383_v14 }
 0x152   : > { %v397_v3 = vsel %vm224_vm0, %v393_v5, 0.0  ;;  %v320_v40 = vmul.f32 0.6931472, %v626_v11 }
 0x153   : > { %v399_v32 = vadd.f32 %v398_v38, %v397_v3  ;;  %v400_v42 = vsel %vm224_vm0, %v395_v33, 0.0 }
 0x154   : > { %v324_v54 = vsub.f32 %v312_v21, %v320_v40 }
 0x155   : > { %v401_v55 = vadd.f32 %v400_v42, %v399_v32 }
 0x156   : > { %v392_v20 = vsub.f32 %v388_v52, %v324_v54 }
 0x158   : > { %v396_v56 = vmul.f32 %v392_v20, %v384_v12 }
 0x15a   : > { %v402_v57 = vsel %vm224_vm0, %v396_v56, 0.0 }
 0x15b   : > { %v403_v58 = vadd.f32 %v402_v57, %v401_v55 }
 0x15d   : > { %405 = vst.msk [vmem:[%s205_s17] sm:$0xff] %vm224_vm0, %v403_v58 }
 0x15e   : > { %714 = shalt.err (!%p711_p0)
}
 0x15f   : > { %538 = dma.vmem_to_hbm [thread:$0]  (%p826_p11), %s420_s19, 128, %s422_s29, %s407_s13  }
 0x160 PF: > { %s433_s23 = sand.u32 1, %s745_s9   ;;  %p1179_p1 = scmp.ge.s32.totalorder %s757_s12, 2 }
 0x161   : > { %s434_s14 = scalar_lea.sflag [#allocation4], %s433_s23 }
 0x162   : > { %p548_p4 = pnand %p1179_p1, %p830_p12 }
 0x164   : > { %p549_p7 = pneg %p548_p4 }
 0x166   : > { %740 = dma.done.wait (%p549_p7), %s434_s14, 128  }
 0x167   : > { %742 = vsyncadd (%p549_p7), %s434_s14, 4294967168  ;;  %p18_p5 = scmp.ge.s32.totalorder %s801_s15, 4   ;;  %s1180_s9 = smov %s749_s10 }
 0x168   : > { %s1181_s10 = smov %s753_s11  ;;  %s1182_s11 = smov %s813_s18 }
 0x169   : > { %s1183_s12 = smov %s801_s15  ;;  %20 = sbr.rel (!%p18_p5) target bundleno = 7 (0x7), region = 86 }
 0x16e   :  { %440 = vsyncpa [#allocation3], 1 }
 0x16f   :  { %442 = vsyncpa [#allocation3 + $0x1], 1 }
 0x170   :  { %443 = vsyncpa [#allocation6], 1 }
 0x171   :  { %445 = vsyncpa [#allocation6 + $0x1], 1 }
 0x172   :  { %446 = vsyncpa [#allocation4], 1 }
 0x173   :  { %448 = vsyncpa [#allocation4 + $0x1], 1 }

</bundles_post_ra>
